<compile_context>
chip_gen: v7x
topology: tpu7x:2x2x1
jax: 0.10.0
libtpu: 0.0.40
codegen_flags: <defaults>
</compile_context>

<pallas_src>
import math
from functools import partial

import jax
import jax.numpy as jnp
from jax import lax
from jax.experimental import pallas as pl
from jax.experimental.pallas import tpu as pltpu


def _rup(v, m):
    return (v + m - 1) // m * m


def _is_multi_tensorcore():
    """True on chips with >1 TensorCore per chip (v7x); False on v5e/v6e/others."""
    try:
        kind = (getattr(jax.devices()[0], "device_kind", "") or "").lower()
        return "7" in kind
    except Exception:
        return False


_MULTI_TC = _is_multi_tensorcore()
_TM_CAP = 512 if _MULTI_TC else 1024           # v5e/v6e have 128 MiB VMEM -> bigger M tiles
_TK_CAP = 1024
_TN_CAP = 512
_VMEM_LIMIT = (32 if _MULTI_TC else 64) * 1024 * 1024


# ----------------------------------------------------------------------------
# Pallas batched GEMM kernel:  out[g] = act(A[g] @ B[g] + bias)   (bf16 out, f32 acc)
# ----------------------------------------------------------------------------
def _make_gemm_kernel(act, nk):
    def epilogue(r, bias_ref, alpha_ref):
        r = r + bias_ref[...]
        if act == "relu":
            r = jnp.maximum(r, 0.0)
        elif act == "prelu":
            a = alpha_ref[0]                      # scalar PReLU weight from SMEM
            r = jnp.where(r >= 0.0, r, a * r)
        return r

    if nk == 1:
        # single K block: no accumulation loop, no scratch
        def kernel(a_ref, b_ref, bias_ref, alpha_ref, o_ref):
            r = jnp.dot(a_ref[...], b_ref[...], preferred_element_type=jnp.float32)
            o_ref[...] = epilogue(r, bias_ref, alpha_ref).astype(o_ref.dtype)
    else:
        # f32 VMEM scratch accumulator; bf16 output written once at the end
        def kernel(a_ref, b_ref, bias_ref, alpha_ref, o_ref, acc_ref):
            kk = pl.program_id(3)

            @pl.when(kk == 0)
            def _():
                acc_ref[...] = jnp.zeros_like(acc_ref)

            acc_ref[...] += jnp.dot(a_ref[...], b_ref[...],
                                    preferred_element_type=jnp.float32)

            @pl.when(kk == nk - 1)
            def _():
                o_ref[...] = epilogue(acc_ref[...], bias_ref, alpha_ref).astype(o_ref.dtype)

    return kernel


def _plan_gemm(G, M, K, N):
    """Shape-adaptive tiles; avoid any padding whenever a dim fits in one block."""
    if K <= _TK_CAP:
        TK, Kp = K, K                   # full-extent last dim: no K padding
    else:
        TK = _TK_CAP
        Kp = _rup(K, TK)
    if N <= _TN_CAP:
        TN, Np = N, N                   # full-extent last dim: no N padding
    else:
        TN = _TN_CAP
        Np = _rup(N, TN)
    if M <= _TM_CAP:
        TM, Mp = M, M                   # full-extent second-minor dim: no M padding
    else:
        TM = _TM_CAP                    # multiple of 16 (bf16 sublane packing)
        Mp = _rup(M, TM)
    # Megacore split: only on multi-TC chips (v7x), only when the grid would
    # otherwise have a single parallel step, and only if the half-tile stays >= 256.
    if _MULTI_TC and G * (Mp // TM) * (Np // TN) == 1 and M >= 512 and M % 32 == 0:
        TM = M // 2
    return Mp, Kp, Np, TM, TK, TN


def _gemm_bias_act(A, B, bias, alpha, act):
    """A: (G, M, K) bf16, B: (G, K, N) bf16, bias: (N,) f32 -> (G, M, N) bf16."""
    G, M, K = A.shape
    N = B.shape[2]
    Mp, Kp, Np, TM, TK, TN = _plan_gemm(G, M, K, N)
    nm, nn, nk = Mp // TM, Np // TN, Kp // TK

    # Only pad when a dim genuinely does not fit in one block (never in this module).
    Ap = A if (Mp == M and Kp == K) else jnp.pad(A, ((0, 0), (0, Mp - M), (0, Kp - K)))
    Bp = B if (Kp == K and Np == N) else jnp.pad(B, ((0, 0), (0, Kp - K), (0, Np - N)))
    bias_p = bias.astype(jnp.float32).reshape(1, -1)
    if Np != N:
        bias_p = jnp.pad(bias_p, ((0, 0), (0, Np - N)))
    alpha_arr = jnp.reshape(alpha, (1,)).astype(jnp.float32)

    cost = pl.CostEstimate(
        flops=2 * G * Mp * Kp * Np,
        transcendentals=0,
        bytes_accessed=Ap.size * 2 + Bp.size * 2 + G * Mp * Np * 2,
    )

    scratch = [] if nk == 1 else [pltpu.VMEM((TM, TN), jnp.float32)]

    out = pl.pallas_call(
        _make_gemm_kernel(act, nk),
        out_shape=jax.ShapeDtypeStruct((G, Mp, Np), jnp.bfloat16),
        grid=(G, nm, nn, nk),
        in_specs=[
            pl.BlockSpec((None, TM, TK), lambda g, i, j, k: (g, i, k)),
            pl.BlockSpec((None, TK, TN), lambda g, i, j, k: (g, k, j)),
            pl.BlockSpec((1, TN), lambda g, i, j, k: (0, j)),
            pl.BlockSpec(memory_space=pltpu.MemorySpace.SMEM),   # PReLU alpha scalar
        ],
        out_specs=pl.BlockSpec((None, TM, TN), lambda g, i, j, k: (g, i, j)),
        scratch_shapes=scratch,
        compiler_params=pltpu.CompilerParams(
            dimension_semantics=("parallel", "parallel", "parallel", "arbitrary"),
            vmem_limit_bytes=_VMEM_LIMIT,
        ),
        cost_estimate=cost,
    )(Ap, Bp, bias_p, alpha_arr)

    if Mp != M or Np != N:
        out = out[:, :M, :N]
    return out


# ----------------------------------------------------------------------------
# Conv2d(k=4, s=2, p=1) + PReLU   (bf16 NHWC activations, pre-packed bf16 weights)
# ----------------------------------------------------------------------------
def conv4x4_s2_prelu(x, w_mat, b, alpha):
    N, H, W, Ci = x.shape
    OH = (H + 2 - 4) // 2 + 1
    OW = (W + 2 - 4) // 2 + 1
    xp = jnp.pad(x, ((0, 0), (1, 1), (1, 1), (0, 0)))
    # TODO(synk): build these 16 taps inside the kernel from a halo'd VMEM-resident
    # input block instead of materializing the expanded A in HBM.
    taps = []
    for di in range(4):
        for dj in range(4):
            taps.append(xp[:, di:di + 2 * (OH - 1) + 1:2, dj:dj + 2 * (OW - 1) + 1:2, :])
    A = jnp.stack(taps, axis=3).reshape(N * OH * OW, 16 * Ci)      # bf16, K order (di, dj, ci)
    out = _gemm_bias_act(A[None], w_mat[None], b, alpha, "prelu")[0]
    return out.reshape(N, OH, OW, -1)


# ----------------------------------------------------------------------------
# ConvTranspose2d(k=4, s=2, p=1) + PReLU via sub-pixel (4-phase) decomposition.
# The 4 phase GEMMs are batched into a single pallas_call (leading parallel axis).
# ----------------------------------------------------------------------------
def deconv4x4_s2_prelu(x, w_phase, b, alpha):
    N, H, W, Ci = x.shape
    xp = jnp.pad(x, ((0, 0), (1, 1), (1, 1), (0, 0)))
    A_list = []
    for py in range(2):
        for px in range(2):
            taps = []
            for oy in range(2):
                for ox in range(2):
                    taps.append(xp[:, py + oy:py + oy + H, px + ox:px + ox + W, :])
            A_list.append(jnp.stack(taps, axis=3).reshape(N * H * W, 4 * Ci))
    A = jnp.stack(A_list, axis=0)                                  # (4, N*H*W, 4*Ci) bf16
    out = _gemm_bias_act(A, w_phase, b, alpha, "prelu")            # (4, N*H*W, Co) bf16
    Co = out.shape[-1]
    # TODO(synk): scatter phases directly via the output index_map to avoid this
    # (now bf16, half-sized) relayout.
    out = out.reshape(2, 2, N, H, W, Co).transpose(2, 3, 0, 4, 1, 5)
    return out.reshape(N, 2 * H, 2 * W, Co)


# ----------------------------------------------------------------------------
# module ports
# ----------------------------------------------------------------------------
class PallasConvBlock:
    """ConvBlock: Conv2d(cin, cout, 4, stride=2, padding=1, bias=True) + PReLU."""
    def __init__(self, key, cin, cout):
        kw_, kb_ = jax.random.split(key)
        bound = 1.0 / math.sqrt(cin * 16)
        self.w_raw = jax.random.uniform(kw_, (cout, cin, 4, 4), jnp.float32, -bound, bound)
        self.b = jax.random.uniform(kb_, (cout,), jnp.float32, -bound, bound)
        self.alpha = jnp.float32(0.25)          # torch.nn.PReLU() default (shared weight)
        # GEMM-ready bf16 weight, packed once at init: K order (di, dj, ci).
        self.w_mat = jnp.transpose(self.w_raw, (2, 3, 1, 0)).reshape(16 * cin, cout) \
                        .astype(jnp.bfloat16)

    def __call__(self, x_nhwc):
        return conv4x4_s2_prelu(x_nhwc.astype(jnp.bfloat16), self.w_mat, self.b, self.alpha)


class PallasDeconvBlock:
    """DeconvBlock: ConvTranspose2d(cin, cout, 4, stride=2, padding=1, bias=True) + PReLU."""
    def __init__(self, key, cin, cout):
        kw_, kb_ = jax.random.split(key)
        bound = 1.0 / math.sqrt(cout * 16)
        self.w_raw = jax.random.uniform(kw_, (cin, cout, 4, 4), jnp.float32, -bound, bound)
        self.b = jax.random.uniform(kb_, (cout,), jnp.float32, -bound, bound)
        self.alpha = jnp.float32(0.25)
        # Per-phase 2x2 sub-pixel weights, packed once at init: (4, 4*Ci, Co) bf16.
        phases = []
        for py in range(2):
            for px in range(2):
                wts = []
                for oy in range(2):
                    for ox in range(2):
                        wts.append(self.w_raw[:, :, 3 - py - 2 * oy, 3 - px - 2 * ox])
                phases.append(jnp.stack(wts, axis=0).reshape(4 * cin, cout))
        self.w_phase = jnp.stack(phases, axis=0).astype(jnp.bfloat16)

    def __call__(self, x_nhwc):
        return deconv4x4_s2_prelu(x_nhwc.astype(jnp.bfloat16), self.w_phase, self.b, self.alpha)


def _mdc_forward(ft_l, ft_h_list, up_fns, down_fns, num_ft, mode):
    """Exact port of Encoder_MDCBlock1.forward (all modes), generic over conv callables."""
    if mode in ("iter1", "conv"):
        ft_l_list = []
        cur = ft_l
        for i in range(len(ft_h_list)):
            ft_l_list.append(cur)
            cur = up_fns[num_ft - len(ft_h_list) + i](cur)
        ft_fusion = cur
        for i in range(len(ft_h_list)):
            ft_fusion = down_fns[num_ft - i - 1](ft_fusion - ft_h_list[i]) \
                        + ft_l_list[len(ft_h_list) - i - 1]
    elif mode == "iter2":
        ft_fusion = ft_l
        for i in range(len(ft_h_list)):
            ft = ft_fusion
            for j in range(num_ft - i):
                ft = up_fns[j](ft)
            ft = ft - ft_h_list[i]
            for j in range(num_ft - i):
                ft = down_fns[num_ft - i - j - 1](ft)
            ft_fusion = ft_fusion + ft
    elif mode == "iter3":
        ft_fusion = ft_l
        for i in range(len(ft_h_list)):
            ft = ft_fusion
            for j in range(i + 1):
                ft = up_fns[j](ft)
            ft = ft - ft_h_list[len(ft_h_list) - i - 1]
            for j in range(i + 1):
                ft = down_fns[i + 1 - j - 1](ft)
            ft_fusion = ft_fusion + ft
    elif mode == "iter4":
        ft_fusion = ft_l
        for i in range(len(ft_h_list)):
            ft = ft_l
            for j in range(num_ft - i):
                ft = up_fns[j](ft)
            ft = ft - ft_h_list[i]
            for j in range(num_ft - i):
                ft = down_fns[num_ft - i - j - 1](ft)
            ft_fusion = ft_fusion + ft
    else:
        raise ValueError(f"unknown mode {mode!r}")
    return ft_fusion


class EncoderMDCBlock1:
    """Pallas port of Encoder_MDCBlock1 (kernel_size=4, stride=2, padding=1, PReLU)."""
    def __init__(self, key, num_filter, num_ft, mode="iter1"):
        self.mode = mode
        self.num_ft = num_ft - 1
        self.up_convs, self.down_convs = [], []
        keys = jax.random.split(key, max(2 * self.num_ft, 1))
        for i in range(self.num_ft):
            self.up_convs.append(
                PallasDeconvBlock(keys[2 * i], num_filter // 2 ** i, num_filter // 2 ** (i + 1)))
            self.down_convs.append(
                PallasConvBlock(keys[2 * i + 1], num_filter // 2 ** (i + 1), num_filter // 2 ** i))
        self._fwd = jax.jit(self._forward)

    def _forward(self, ft_l, ft_h_list):
        # layout + dtype converted once at the module boundary; chain stays bf16 NHWC
        to_nhwc = lambda t: jnp.transpose(t, (0, 2, 3, 1)).astype(jnp.bfloat16)
        out = _mdc_forward(
            to_nhwc(ft_l), [to_nhwc(t) for t in ft_h_list],
            [blk.__call__ for blk in self.up_convs],
            [blk.__call__ for blk in self.down_convs],
            self.num_ft, self.mode)
        return jnp.transpose(out, (0, 3, 1, 2)).astype(jnp.float32)   # back to NCHW f32

    def __call__(self, ft_l, ft_h_list):
        return self._fwd(ft_l, tuple(ft_h_list))


# ----------------------------------------------------------------------------
# pure-JAX (XLA conv) reference, used only to sanity-check the Pallas path
# ----------------------------------------------------------------------------
def _ref_conv_block(x, w, b, alpha):
    y = lax.conv_general_dilated(x, w, window_strides=(2, 2), padding=((1, 1), (1, 1)),
                                 dimension_numbers=("NCHW", "OIHW", "NCHW"),
                                 precision=lax.Precision.HIGHEST)
    y = y + b.reshape(1, -1, 1, 1)
    return jnp.where(y >= 0, y, alpha * y)


def _ref_deconv_block(x, w, b, alpha):
    y = lax.conv_general_dilated(x, jnp.flip(w, (2, 3)), window_strides=(1, 1),
                                 padding=((2, 2), (2, 2)), lhs_dilation=(2, 2),
                                 dimension_numbers=("NCHW", "IOHW", "NCHW"),
                                 precision=lax.Precision.HIGHEST)
    y = y + b.reshape(1, -1, 1, 1)
    return jnp.where(y >= 0, y, alpha * y)


def _reference_forward(enc, ft_l, ft_h_list):
    up_fns = [partial(_ref_deconv_block, w=blk.w_raw, b=blk.b, alpha=blk.alpha)
              for blk in enc.up_convs]
    down_fns = [partial(_ref_conv_block, w=blk.w_raw, b=blk.b, alpha=blk.alpha)
                for blk in enc.down_convs]
    return _mdc_forward(ft_l, list(ft_h_list), up_fns, down_fns, enc.num_ft, enc.mode)


# ----------------------------------------------------------------------------
if __name__ == "__main__":
    key = jax.random.PRNGKey(0)
    k_mod, k_l, k_h0, k_h1, k_c, k_d = jax.random.split(key, 6)

    num_filter, num_ft = 32, 3
    N, H, W = 2, 4, 4
    ft_l = jax.random.normal(k_l, (N, num_filter, H, W), jnp.float32)
    ft_h_list = [
        jax.random.normal(k_h0, (N, num_filter // 4, H * 4, W * 4), jnp.float32),
        jax.random.normal(k_h1, (N, num_filter // 2, H * 2, W * 2), jnp.float32),
    ]

    enc = EncoderMDCBlock1(k_mod, num_filter, num_ft, mode="iter1")

    # --- per-layer checks (tight; reference gets the same bf16-rounded data) ---
    blk = enc.down_convs[0]                                    # Conv 16 -> 32
    xc16 = jax.random.normal(k_c, (N, 8, 8, 16), jnp.float32).astype(jnp.bfloat16)
    y = jax.block_until_ready(blk(xc16))
    ref = _ref_conv_block(jnp.transpose(xc16.astype(jnp.float32), (0, 3, 1, 2)),
                          blk.w_raw.astype(jnp.bfloat16).astype(jnp.float32),
                          blk.b, blk.alpha)
    ref = jnp.transpose(ref, (0, 2, 3, 1))
    errc = float(jnp.max(jnp.abs(y.astype(jnp.float32) - ref)) / (jnp.max(jnp.abs(ref)) + 1e-6))
    assert errc < 2e-2, ("conv_block", errc)

    blk = enc.up_convs[0]                                      # Deconv 32 -> 16
    xd16 = jax.random.normal(k_d, (N, 4, 4, 32), jnp.float32).astype(jnp.bfloat16)
    y = jax.block_until_ready(blk(xd16))
    ref = _ref_deconv_block(jnp.transpose(xd16.astype(jnp.float32), (0, 3, 1, 2)),
                            blk.w_raw.astype(jnp.bfloat16).astype(jnp.float32),
                            blk.b, blk.alpha)
    ref = jnp.transpose(ref, (0, 2, 3, 1))
    errd = float(jnp.max(jnp.abs(y.astype(jnp.float32) - ref)) / (jnp.max(jnp.abs(ref)) + 1e-6))
    assert errd < 2e-2, ("deconv_block", errd)

    # --- end-to-end; 'iter1' is the PyTorch default, 'iter2' is how RDFF uses it ---
    for mode in ("iter1", "iter2"):
        enc = EncoderMDCBlock1(k_mod, num_filter, num_ft, mode=mode)
        out = jax.block_until_ready(enc(ft_l, ft_h_list))
        assert out.shape == ft_l.shape, (mode, out.shape)
        assert bool(jnp.all(jnp.isfinite(out))), mode
        ref = jax.block_until_ready(_reference_forward(enc, ft_l, ft_h_list))
        err = float(jnp.max(jnp.abs(out - ref)) / (jnp.max(jnp.abs(ref)) + 1e-6))
        assert err < 8e-2, (mode, err)     # bf16 chain vs f32 XLA reference

    print("KERNEL_OK")
</pallas_src>

<mosaic_0001>
module attributes {stable_mosaic.version = 11 : i64} {
  func.func @kernel(%arg0: i32, %arg1: i32, %arg2: i32, %arg3: i32, %arg4: memref<1x32x256xbf16, #tpu.memory_space<vmem>>, %arg5: memref<1x256x32xbf16, #tpu.memory_space<vmem>>, %arg6: memref<1x32xf32, #tpu.memory_space<vmem>>, %arg7: memref<1xf32, #tpu.memory_space<smem>>, %arg8: memref<1x32x32xbf16, #tpu.memory_space<vmem>>) attributes {dimension_semantics = [#tpu.dimension_semantics<parallel>, #tpu.dimension_semantics<parallel>, #tpu.dimension_semantics<parallel>, #tpu.dimension_semantics<arbitrary>], iteration_bounds = array<i64: 1, 1, 1, 1>, scalar_prefetch = 0 : i64, scratch_operands = 0 : i64, tpu.core_type = #tpu.core_type<tc>, window_params = [{transform_indices = @transform_0, window_bounds = array<i64: 1, 32, 256>}, {transform_indices = @transform_1, window_bounds = array<i64: 1, 256, 32>}, {transform_indices = @transform_2, window_bounds = array<i64: 1, 32>}, {transform_indices = @transform_3, window_bounds = array<i64: 1>}, {transform_indices = @transform_4, window_bounds = array<i64: 1, 32, 32>}]} {
    %c0 = arith.constant 0 : index
    %c0_0 = arith.constant 0 : index
    %c0_1 = arith.constant 0 : index
    %0 = vector.load %arg4[%c0, %c0_0, %c0_1] : memref<1x32x256xbf16, #tpu.memory_space<vmem>>, vector<1x32x256xbf16>
    %1 = vector.shape_cast %0 : vector<1x32x256xbf16> to vector<32x256xbf16>
    %c0_2 = arith.constant 0 : index
    %c0_3 = arith.constant 0 : index
    %c0_4 = arith.constant 0 : index
    %2 = vector.load %arg5[%c0_2, %c0_3, %c0_4] : memref<1x256x32xbf16, #tpu.memory_space<vmem>>, vector<1x256x32xbf16>
    %3 = vector.shape_cast %2 : vector<1x256x32xbf16> to vector<256x32xbf16>
    %cst = arith.constant dense<0.000000e+00> : vector<32x32xf32>
    %4 = tpu.matmul %1, %3, %cst {dimension_numbers = #tpu.dot_dimension_numbers<[1], [0], [0], [1], [0, 0, 1, 1], [], []>} : vector<32x256xbf16>, vector<256x32xbf16>, vector<32x32xf32> -> vector<32x32xf32>
    %c0_5 = arith.constant 0 : index
    %c0_6 = arith.constant 0 : index
    %5 = vector.load %arg6[%c0_5, %c0_6] : memref<1x32xf32, #tpu.memory_space<vmem>>, vector<1x32xf32>
    %6 = vector.broadcast %5 : vector<1x32xf32> to vector<32x32xf32>
    %7 = arith.addf %4, %6 : vector<32x32xf32>
    %c0_7 = arith.constant 0 : index
    %8 = memref.load %arg7[%c0_7] : memref<1xf32, #tpu.memory_space<smem>>
    %cst_8 = arith.constant 0.000000e+00 : f32
    %9 = vector.broadcast %cst_8 : f32 to vector<32x32xf32>
    %10 = arith.cmpf oge, %7, %9 : vector<32x32xf32>
    %11 = vector.broadcast %8 : f32 to vector<32x32xf32>
    %12 = arith.mulf %11, %7 : vector<32x32xf32>
    %13 = arith.select %10, %7, %12 : vector<32x32xi1>, vector<32x32xf32>
    %14 = arith.truncf %13 : vector<32x32xf32> to vector<32x32xbf16>
    %c0_9 = arith.constant 0 : index
    %c0_10 = arith.constant 0 : index
    %c0_11 = arith.constant 0 : index
    %15 = vector.load %arg8[%c0_9, %c0_10, %c0_11] : memref<1x32x32xbf16, #tpu.memory_space<vmem>>, vector<1x32x32xbf16>
    %16 = vector.shape_cast %15 : vector<1x32x32xbf16> to vector<32x32xbf16>
    %17 = vector.shape_cast %14 : vector<32x32xbf16> to vector<1x32x32xbf16>
    tpu.vector_store %arg8[%c0_9, %c0_10, %c0_11], %17 {strides = array<i32>} : memref<1x32x32xbf16, #tpu.memory_space<vmem>>, vector<1x32x32xbf16>,
    return
  }
  func.func @transform_0(%arg0: i32, %arg1: i32, %arg2: i32, %arg3: i32) -> (i32, i32, i32) {
    %c0_i32 = arith.constant 0 : i32
    return %arg0, %arg1, %arg3 : i32, i32, i32
  }
  func.func @transform_1(%arg0: i32, %arg1: i32, %arg2: i32, %arg3: i32) -> (i32, i32, i32) {
    %c0_i32 = arith.constant 0 : i32
    return %arg0, %arg3, %arg2 : i32, i32, i32
  }
  func.func @transform_2(%arg0: i32, %arg1: i32, %arg2: i32, %arg3: i32) -> (i32, i32) {
    %c0_i32 = arith.constant 0 : i32
    %c0_i32_0 = arith.constant 0 : i32
    return %c0_i32, %arg2 : i32, i32
  }
  func.func @transform_3(%arg0: i32, %arg1: i32, %arg2: i32, %arg3: i32) -> i32 {
    %c0_i32 = arith.constant 0 : i32
    %c0_i32_0 = arith.constant 0 : i32
    return %c0_i32 : i32
  }
  func.func @transform_4(%arg0: i32, %arg1: i32, %arg2: i32, %arg3: i32) -> (i32, i32, i32) {
    %c0_i32 = arith.constant 0 : i32
    return %arg0, %arg1, %arg2 : i32, i32, i32
  }
}

</mosaic_0001>

<bundles_post_ra>
// kernel: tpu_custom_call.1
= control target key start
LH: loop header
LB: loop body
LE: loop exit
PB: predicated region body
PF: predicated region fallthrough
CT: control target
= control target key end

     0   :  { %10 = vsyncpa [#allocation4], 0  ;;  %s611_s0 = inlined_call_operand.hbm [shape: bf16[1,32,256], index: 0, kind: input, shape index: {}]   ;;  %s612_s1 = inlined_call_operand.hbm [shape: bf16[1,256,32], index: 1, kind: input, shape index: {}]   ;;  %s613_s2 = inlined_call_operand.hbm [shape: f32[1,32], index: 2, kind: input, shape index: {}]   ;;  %s614_s3 = inlined_call_operand.<no memory space> [shape: f32[1], index: 3, kind: input, shape index: {}]   ;;  %s615_s4 = inlined_call_operand.hbm [shape: bf16[1,32,32], index: 4, kind: output, shape index: {}]  }
   0x1   :  { %11 = vsyncpa [#allocation7], 0 }
   0x2   :  { %12 = vsyncpa [#allocation5], 0  ;;  %s517_s15 = smov [#allocation6]   ;;  %s423_s19 = scalar_lea.hbm %s612_s1, 2048 }
   0x3   :  { %s30_s16 = sshll.u32 %s517_s15, 4  ;;  %p424_p0 = scmp.ne.s32.totalorder %s612_s1, %s423_s19  ;;  %s31_s16 = int_to_ptr.vmem [resolvable:$true] %s30_s16 }
   0x4   :  { %p427_p1 = scmp.lt.u32.totalorder %s423_s19, %s612_s1 }
   0x6   :  { %p429_p2 = pnand %p427_p1, %p424_p0 }
   0x8   :  { %432 = shalt.err (!%p429_p2)
}
   0x9   :  { %s433_s24 = scalar_lea.vmem %s31_s16, 2048  ;;  %p438_p4 = scmp.lt.s32.totalorder %s31_s16, %s31_s16 }
   0xa   :  { %p434_p3 = scmp.ne.s32.totalorder %s31_s16, %s433_s24  ;;  %p439_p5 = scmp.lt.s32.totalorder %s433_s24, %s433_s24 }
   0xc   :  { %p440_p6 = por %p439_p5, %p438_p4 }
   0xe   :  { %p441_p7 = pnand %p440_p6, %p434_p3 }
  0x10   :  { %444 = shalt.err (!%p441_p7)
}
  0x11   :  { %s518_s25 = smov 64   ;;  %s519_s26 = smov 4  }
  0x12   :  { %36 = dma.hbm_to_vmem [thread:$0]  %s612_s1, 2048, %s31_s16, [#allocation7], %s518_s25, %s518_s25, %s519_s26  }
  0x13   :  { %s520_s29 = smov [#allocation3]   ;;  %s445_s7 = scalar_lea.hbm %s611_s0, 512 }
  0x14   :  { %s18_s30 = sshll.u32 %s520_s29, 4  ;;  %p446_p8 = scmp.ne.s32.totalorder %s611_s0, %s445_s7  ;;  %s19_s30 = int_to_ptr.vmem [resolvable:$true] %s18_s30 }
  0x15   :  { %p449_p9 = scmp.lt.u32.totalorder %s445_s7, %s611_s0 }
  0x17   :  { %p451_p10 = pnand %p449_p9, %p446_p8 }
  0x19   :  { %454 = shalt.err (!%p451_p10)
}
  0x1a   :  { %s455_s12 = scalar_lea.vmem %s19_s30, 512  ;;  %p460_p12 = scmp.lt.s32.totalorder %s19_s30, %s19_s30 }
  0x1b   :  { %p456_p11 = scmp.ne.s32.totalorder %s19_s30, %s455_s12  ;;  %p461_p13 = scmp.lt.s32.totalorder %s455_s12, %s455_s12 }
  0x1d   :  { %p462_p0 = por %p461_p13, %p460_p12 }
  0x1f   :  { %p463_p1 = pnand %p462_p0, %p456_p11 }
  0x21   :  { %466 = shalt.err (!%p463_p1)
}
  0x22   :  { %s521_s1 = smov 128   ;;  %s522_s13 = smov 8  }
  0x23   :  { %24 = dma.hbm_to_vmem [thread:$0]  %s611_s0, 512, %s19_s30, [#allocation4], %s521_s1, %s521_s1, %s522_s13  }
  0x24   :  { %s523_s16 = smov [#allocation8]   ;;  %s467_s20 = scalar_lea.hbm %s613_s2, 16 }
  0x25   :  { %s43_s17 = sshll.u32 %s523_s16, 4  ;;  %p468_p2 = scmp.ne.s32.totalorder %s613_s2, %s467_s20  ;;  %s44_s17 = int_to_ptr.vmem [resolvable:$true] %s43_s17 }
  0x26   :  { %p471_p3 = scmp.lt.u32.totalorder %s467_s20, %s613_s2 }
  0x28   :  { %p473_p4 = pnand %p471_p3, %p468_p2 }
  0x2a   :  { %476 = shalt.err (!%p473_p4)
}
  0x2b   :  { %s477_s27 = scalar_lea.vmem %s44_s17, 16  ;;  %s481_s0 = scalar_lea.vmem %s44_s17, 32 }
  0x2c   :  { %p478_p5 = scmp.ne.s32.totalorder %s44_s17, %s477_s27  ;;  %p482_p6 = scmp.lt.s32.totalorder %s44_s17, %s44_s17 }
  0x2d   :  { %p483_p7 = scmp.lt.s32.totalorder %s481_s0, %s477_s27 }
  0x2f   :  { %p484_p8 = por %p483_p7, %p482_p6 }
  0x31   :  { %p485_p9 = pnand %p484_p8, %p478_p5 }
  0x33   :  { %488 = shalt.err (!%p485_p9)
}
  0x34   :  { %46 = dma.hbm_to_vmem [thread:$0]  %s613_s2, 16, %s44_s17, [#allocation7]  }
  0x35   :  { %511 = dma.done.wait [#allocation4], 512  }
  0x36   :  { %512 = vsyncadd [#allocation4], 4294966784 }
  0x37   :  { %513 = dma.done.wait [#allocation7], 2064  }
  0x38   :  { %514 = vsyncadd [#allocation7], 4294965232  ;;  %v401_v0 = vld [vmem:[#allocation6 + $0x40] sm:$0xff]   ;;  %v403_v2 = vld [vmem:[#allocation6 + $0x48] sm:$0xff]   ;;  %v272_v29 = vstv %s614_s3  ;;  %vm297_vm2 = vcmask 257024   ;;  %s524_s3 = smov [#allocation9]  }
  0x39   :  { %v402_v1 = vld [vmem:[#allocation6] sm:$0xff]   ;;  %349 = vmatprep.subr.bf16.mxu0 %v401_v0  ;;  %377 = vmatprep.subr.bf16.mxu1 %v401_v0  ;;  %v404_v3 = vld [vmem:[#allocation6 + $0x8] sm:$0xff]   ;;  %v405_v4 = vld [vmem:[#allocation6 + $0x50] sm:$0xff]   ;;  %s307_s5 = sshll.u32 %s524_s3, 4  ;;  %s308_s5 = int_to_ptr.vmem [resolvable:$true] %s307_s5 }
  0x3a   :  { %350 = vmatpush3.bf16.msra.mxu0 %v402_v1  ;;  %385 = vmatpush3.bf16.msra.mxu1 %v402_v1  ;;  %v406_v5 = vld [vmem:[#allocation6 + $0x10] sm:$0xff]   ;;  %v407_v6 = vld [vmem:[#allocation6 + $0x58] sm:$0xff]   ;;  %v409_v8 = vld [vmem:[#allocation6 + $0x60] sm:$0xff]   ;;  %s489_s6 = scalar_lea.vmem %s308_s5, 256  ;;  %p494_p11 = scmp.lt.s32.totalorder %s308_s5, %s308_s5 }
  0x3b   :  { %351 = vmatprep.subr.bf16.mxu0 %v403_v2  ;;  %378 = vmatprep.subr.bf16.mxu1 %v403_v2  ;;  %v408_v7 = vld [vmem:[#allocation6 + $0x18] sm:$0xff]   ;;  %v410_v9 = vld [vmem:[#allocation6 + $0x20] sm:$0xff]   ;;  %v411_v10 = vld [vmem:[#allocation6 + $0x68] sm:$0xff]   ;;  %p490_p10 = scmp.ne.s32.totalorder %s308_s5, %s489_s6  ;;  %p495_p12 = scmp.lt.s32.totalorder %s489_s6, %s489_s6 }
  0x3c   :  { %v419_v11 = vld [vmem:[#allocation3 + $0x4] ss:$8 sps:$4 sm:$0xff]   ;;  %v422_v12 = vld [vmem:[#allocation3 + $0x14] ss:$8 sps:$4 sm:$0xff]   ;;  %v417_v18 = vld [vmem:[#allocation3] ss:$8 sps:$4 sm:$0xff]  }
  0x3d   :  { %v412_v13 = vld [vmem:[#allocation6 + $0x28] sm:$0xff]   ;;  %v413_v14 = vld [vmem:[#allocation6 + $0x70] sm:$0xff]   ;;  %250 = vmatprep.mubr.bf16.mxu0 %v419_v11  ;;  %258 = vmatprep.mubr.bf16.mxu1 %v422_v12  ;;  %v415_v16 = vld [vmem:[#allocation6 + $0x78] sm:$0xff]   ;;  %p496_p13 = por %p495_p12, %p494_p11 }
  0x3e   :  { %352 = vmatpush3.bf16.msra.mxu0 %v404_v3  ;;  %386 = vmatpush3.bf16.msra.mxu1 %v404_v3  ;;  %v414_v15 = vld [vmem:[#allocation6 + $0x30] sm:$0xff]   ;;  %v416_v17 = vld [vmem:[#allocation6 + $0x38] sm:$0xff]   ;;  %v320_v22 = vld [vmem:[#allocation8] ss:$0 sm:$0xff] }
  0x3f   :  { %353 = vmatprep.subr.bf16.mxu0 %v405_v4  ;;  %379 = vmatprep.subr.bf16.mxu1 %v405_v4  ;;  %v420_v19 = vld [vmem:[#allocation3 + $0x10] ss:$8 sps:$4 sm:$0xff]   ;;  %p497_p0 = pnand %p496_p13, %p490_p10 }
  0x42   :  { %354 = vmatpush3.bf16.msra.mxu0 %v406_v5  ;;  %387 = vmatpush3.bf16.msra.mxu1 %v406_v5 }
  0x43   :  { %355 = vmatprep.subr.bf16.mxu0 %v407_v6  ;;  %380 = vmatprep.subr.bf16.mxu1 %v407_v6 }
  0x46   :  { %356 = vmatpush3.bf16.msra.mxu0 %v408_v7  ;;  %388 = vmatpush3.bf16.msra.mxu1 %v408_v7 }
  0x47   :  { %357 = vmatprep.subr.bf16.mxu0 %v409_v8  ;;  %381 = vmatprep.subr.bf16.mxu1 %v409_v8 }
  0x4a   :  { %358 = vmatpush3.bf16.msra.mxu0 %v410_v9  ;;  %389 = vmatpush3.bf16.msra.mxu1 %v410_v9 }
  0x4b   :  { %359 = vmatprep.subr.bf16.mxu0 %v411_v10  ;;  %382 = vmatprep.subr.bf16.mxu1 %v411_v10 }
  0x4e   :  { %360 = vmatpush3.bf16.msra.mxu0 %v412_v13  ;;  %390 = vmatpush3.bf16.msra.mxu1 %v412_v13 }
  0x4f   :  { %361 = vmatprep.subr.bf16.mxu0 %v413_v14  ;;  %383 = vmatprep.subr.bf16.mxu1 %v413_v14 }
  0x52   :  { %362 = vmatpush3.bf16.msra.mxu0 %v414_v15  ;;  %391 = vmatpush3.bf16.msra.mxu1 %v414_v15 }
  0x53   :  { %363 = vmatprep.subr.bf16.mxu0 %v415_v16  ;;  %384 = vmatprep.subr.bf16.mxu1 %v415_v16 }
  0x56   :  { %364 = vmatpush3.bf16.msra.mxu0 %v416_v17  ;;  %392 = vmatpush3.bf16.msra.mxu1 %v416_v17 }
  0x59   :  { %251 = vmatmul.mubr.bf16.vlgmr.msra.gmra.mrb[0].mxu0 %v417_v18  ;;  %259 = vmatmul.mubr.bf16.vlgmr.msra.gmra.mrb[0].mxu1 %v420_v19 }
 0x12c   :  { %v365_v20 = vpop.f32.mrb[0].mxu0  ;;  %v371_v21 = vpop.f32.mrb[0].mxu1 }
 0x12d   :  { %v366_v23 = vpop.f32.mrb[1].mxu0  ;;  %v372_v24 = vpop.f32.mrb[1].mxu1 }
 0x12e   :  { %v367_v25 = vadd.f32 %v366_v23, %v365_v20  ;;  %v373_v26 = vadd.f32 %v372_v24, %v371_v21  ;;  %v368_v27 = vpop.f32.mrb[2].mxu0  ;;  %v374_v28 = vpop.f32.mrb[2].mxu1 }
 0x12f   :  { %v369_v30 = vpop.f32.mrb[3].mxu0  ;;  %v375_v31 = vpop.f32.mrb[3].mxu1 }
 0x130   :  { %v253_v32 = vadd.f32 %v367_v25, %v320_v22  ;;  %v261_v33 = vadd.f32 %v373_v26, %v320_v22  ;;  %v370_v34 = vadd.f32 %v369_v30, %v368_v27  ;;  %v376_v35 = vadd.f32 %v375_v31, %v374_v28 }
 0x132   :  { %vm268_vm0 = vcmp.ge.f32.partialorder %v253_v32, 0.0  ;;  %v273_v36 = vmul.f32 %v272_v29, %v253_v32  ;;  %vm270_vm1 = vcmp.ge.f32.partialorder %v261_v33, 0.0  ;;  %v275_v37 = vmul.f32 %v272_v29, %v261_v33 }
 0x133   :  { %v256_v38 = vadd.f32 %v370_v34, %v320_v22  ;;  %v264_v39 = vadd.f32 %v376_v35, %v320_v22 }
 0x134   :  { %v277_v40 = vsel %vm268_vm0, %v253_v32, %v273_v36  ;;  %v279_v41 = vsel %vm270_vm1, %v261_v33, %v275_v37 }
 0x135   :  { %v345_v42 = vpack.c.bf16 %v277_v40, %v277_v40  ;;  %v347_v43 = vpack.c.bf16 %v279_v41, %v279_v41  ;;  %vm269_vm3 = vcmp.ge.f32.partialorder %v256_v38, 0.0  ;;  %v274_v44 = vmul.f32 %v272_v29, %v256_v38 }
 0x136   :  { %vm271_vm4 = vcmp.ge.f32.partialorder %v264_v39, 0.0  ;;  %v276_v45 = vmul.f32 %v272_v29, %v264_v39 }
 0x137   :  { %v278_v46 = vsel %vm269_vm3, %v256_v38, %v274_v44  ;;  %298 = vst.msk [vmem:[#allocation9] sm:$0xf] %vm297_vm2, %v345_v42  ;;  %300 = vst.msk [vmem:[#allocation9 + $0x8] sm:$0xf] %vm297_vm2, %v347_v43 }
 0x138   :  { %v346_v47 = vpack.c.bf16 %v278_v46, %v278_v46  ;;  %v280_v48 = vsel %vm271_vm4, %v264_v39, %v276_v45 }
 0x139   :  { %v348_v49 = vpack.c.bf16 %v280_v48, %v280_v48 }
 0x13a   :  { %299 = vst.msk [vmem:[#allocation9 + $0x4] sm:$0xf] %vm297_vm2, %v346_v47 }
 0x13b   :  { %301 = vst.msk [vmem:[#allocation9 + $0xc] sm:$0xf] %vm297_vm2, %v348_v49 }
 0x13c   :  { %500 = shalt.err (!%p497_p0)
}
 0x13d   :  { %s501_s9 = scalar_lea.hbm %s615_s4, 256 }
 0x13e   :  { %p502_p1 = scmp.ne.s32.totalorder %s615_s4, %s501_s9  ;;  %p505_p2 = scmp.lt.u32.totalorder %s501_s9, %s615_s4 }
 0x140   :  { %p507_p3 = pnand %p505_p2, %p502_p1 }
 0x142   :  { %510 = shalt.err (!%p507_p3)
}
 0x143   :  { %313 = dma.vmem_to_hbm [thread:$0]  %s308_s5, 256, %s615_s4, [#allocation5], %s518_s25, %s518_s25, %s519_s26  }
 0x144   :  { %515 = dma.done.wait [#allocation5], 256  }
 0x145   :  { %516 = vsyncadd [#allocation5], 4294967040 }
 0x146   :  { %317 = vsyncpa [#allocation4], 1 }
 0x147   :  { %318 = vsyncpa [#allocation7], 1 }
 0x148   :  { %319 = vsyncpa [#allocation5], 1 }

</bundles_post_ra>
